<compile_context>
chip_gen: v7x
topology: tpu7x:2x2x1
jax: 0.10.0
libtpu: 0.0.40
codegen_flags: <defaults>
</compile_context>

<pallas_src>
import functools
import math

import jax
import jax.numpy as jnp
from jax import lax
from jax.experimental import pallas as pl
from jax.experimental.pallas import tpu as pltpu


# ----------------------------------------------------------------------------
# Small helpers
# ----------------------------------------------------------------------------
def _sublane_unit(dtype):
    """Dtype-aware sublane packing unit: 8 for f32, 16 for bf16, 32 for int8."""
    return max(8, 32 // jnp.dtype(dtype).itemsize)


def _pick_tile(dim, target, unit):
    """Largest tile <= target that divides `dim` and is a multiple of `unit`.
    Falls back to the full dim (always a legal block shape)."""
    if dim <= target:
        return dim
    t = (target // unit) * unit
    while t >= unit:
        if dim % t == 0:
            return t
        t -= unit
    return dim  # NOTE: may be large for pathological dims; fine for our shapes


def _vmem_limit(block_specs, scratch_bytes=0):
    """Scoped-VMEM budget from the actual (double-buffered) block sizes,
    with headroom, capped at v7x's 64 MiB physical VMEM."""
    total = scratch_bytes
    for shape, dt in block_specs:
        total += 2 * math.prod(shape) * jnp.dtype(dt).itemsize
    total = int(total * 1.5) + (2 << 20)
    return max(16 << 20, min(total, 64 << 20))


# ----------------------------------------------------------------------------
# Per-head projection:  out[b, h] = x[b] @ w[h] + bias[h]   -> (B, H, S, d_k)
# ----------------------------------------------------------------------------
def _head_proj_kernel(x_ref, w_ref, b_ref, o_ref, acc_ref, *, mxu_dtype):
    kk = pl.program_id(3)

    @pl.when(kk == 0)
    def _init():
        acc_ref[...] = jnp.zeros_like(acc_ref)

    acc_ref[...] += jnp.dot(x_ref[0].astype(mxu_dtype), w_ref[0],
                            preferred_element_type=jnp.float32)

    @pl.when(kk == pl.num_programs(3) - 1)
    def _finalize():
        o_ref[0, 0] = (acc_ref[...] + b_ref[0].astype(jnp.float32)).astype(o_ref.dtype)


def pallas_head_projection(x, w, b, *, tq_target=256, tk_target=512):
    """x: (B, S, D), w: (H, D, d_k) (in,out per head, scale pre-folded),
    b: (H, 1, d_k) fp32.  Returns (B, H, S, d_k) in w.dtype (head-major)."""
    B, S, D = x.shape
    H, _, d_k = w.shape
    sub = _sublane_unit(w.dtype)
    tq = _pick_tile(S, tq_target, sub)
    tk = _pick_tile(D, tk_target, 128)
    vmem = _vmem_limit(
        [((1, tq, tk), x.dtype), ((1, tk, d_k), w.dtype),
         ((1, 1, d_k), b.dtype), ((1, 1, tq, d_k), w.dtype)],
        scratch_bytes=tq * d_k * 4)
    kern = functools.partial(_head_proj_kernel, mxu_dtype=w.dtype)
    return pl.pallas_call(
        kern,
        out_shape=jax.ShapeDtypeStruct((B, H, S, d_k), w.dtype),
        grid=(B, H, S // tq, D // tk),
        in_specs=[
            pl.BlockSpec((1, tq, tk), lambda bb, h, i, k: (bb, i, k)),
            pl.BlockSpec((1, tk, d_k), lambda bb, h, i, k: (h, k, 0)),
            pl.BlockSpec((1, 1, d_k), lambda bb, h, i, k: (h, 0, 0)),
        ],
        out_specs=pl.BlockSpec((1, 1, tq, d_k), lambda bb, h, i, k: (bb, h, i, 0)),
        scratch_shapes=[pltpu.VMEM((tq, d_k), jnp.float32)],
        compiler_params=pltpu.CompilerParams(
            dimension_semantics=("parallel", "parallel", "parallel", "arbitrary"),
            vmem_limit_bytes=vmem,
        ),
    )(x, w, b)


# ----------------------------------------------------------------------------
# Flash-style attention over head-major (B, H, S, d_k) tensors
# ----------------------------------------------------------------------------
def _flash_attn_kernel(q_ref, k_ref, v_ref, o_ref, m_ref, l_ref, acc_ref):
    kv = pl.program_id(3)

    @pl.when(kv == 0)
    def _init():
        m_ref[...] = jnp.full_like(m_ref, -jnp.inf)
        l_ref[...] = jnp.zeros_like(l_ref)
        acc_ref[...] = jnp.zeros_like(acc_ref)

    q = q_ref[0, 0]                      # (tq, d_k)   (1/sqrt(d_k) pre-folded)
    k = k_ref[0, 0]                      # (tkv, d_k)
    v = v_ref[0, 0]                      # (tkv, d_k)

    # Scores: contract the d_k dims directly (MXU; any kh relayout is filler).
    s = lax.dot_general(q, k, (((1,), (1,)), ((), ())),
                        preferred_element_type=jnp.float32)   # (tq, tkv) fp32

    m_prev = m_ref[...]
    m_new = jnp.maximum(m_prev, jnp.max(s, axis=-1, keepdims=True))
    alpha = jnp.exp(m_prev - m_new)                       # fp32 softmax stats
    p = jnp.exp(s - m_new)
    l_ref[...] = alpha * l_ref[...] + jnp.sum(p, axis=-1, keepdims=True)
    acc_ref[...] = alpha * acc_ref[...] + jnp.dot(
        p.astype(v.dtype), v, preferred_element_type=jnp.float32)
    m_ref[...] = m_new

    @pl.when(kv == pl.num_programs(3) - 1)
    def _finalize():
        inv_l = 1.0 / l_ref[...]                          # exact; (tq,1) only
        o_ref[0, 0] = (acc_ref[...] * inv_l).astype(o_ref.dtype)


def pallas_flash_attention(q, k, v, *, tq_target=256, tkv_target=512):
    """q, k, v: (B, H, S, d_k) -> (B, H, S, d_k), online softmax over KV blocks."""
    B, H, S, d_k = q.shape
    sub = _sublane_unit(q.dtype)
    tq = _pick_tile(S, tq_target, sub)
    tkv = _pick_tile(S, tkv_target, sub)
    vmem = _vmem_limit(
        [((1, 1, tq, d_k), q.dtype), ((1, 1, tkv, d_k), k.dtype),
         ((1, 1, tkv, d_k), v.dtype), ((1, 1, tq, d_k), q.dtype)],
        scratch_bytes=(tq * (d_k + 2)) * 4)
    return pl.pallas_call(
        _flash_attn_kernel,
        out_shape=jax.ShapeDtypeStruct((B, H, S, d_k), q.dtype),
        grid=(B, H, S // tq, S // tkv),
        in_specs=[
            pl.BlockSpec((1, 1, tq, d_k), lambda b, h, i, j: (b, h, i, 0)),
            pl.BlockSpec((1, 1, tkv, d_k), lambda b, h, i, j: (b, h, j, 0)),
            pl.BlockSpec((1, 1, tkv, d_k), lambda b, h, i, j: (b, h, j, 0)),
        ],
        out_specs=pl.BlockSpec((1, 1, tq, d_k), lambda b, h, i, j: (b, h, i, 0)),
        scratch_shapes=[pltpu.VMEM((tq, 1), jnp.float32),
                        pltpu.VMEM((tq, 1), jnp.float32),
                        pltpu.VMEM((tq, d_k), jnp.float32)],
        compiler_params=pltpu.CompilerParams(
            dimension_semantics=("parallel", "parallel", "parallel", "arbitrary"),
            vmem_limit_bytes=vmem,
        ),
    )(q, k, v)


# ----------------------------------------------------------------------------
# Plain tiled linear (output projection): y = x @ w + b
# ----------------------------------------------------------------------------
def _linear_kernel(x_ref, w_ref, b_ref, o_ref, acc_ref, *, mxu_dtype):
    kk = pl.program_id(2)

    @pl.when(kk == 0)
    def _init():
        acc_ref[...] = jnp.zeros_like(acc_ref)

    acc_ref[...] += jnp.dot(x_ref[...].astype(mxu_dtype), w_ref[...],
                            preferred_element_type=jnp.float32)

    @pl.when(kk == pl.num_programs(2) - 1)
    def _finalize():
        o_ref[...] = (acc_ref[...] + b_ref[...].astype(jnp.float32)).astype(o_ref.dtype)


def pallas_linear(x, w, b, *, out_dtype=None,
                  tm_target=256, tn_target=2048, tk_target=512):
    """x: (M, K), w: (K, N), b: (1, N).  Full-N weight panels when they fit,
    so the x row-panel streams from HBM once."""
    M, K = x.shape
    N = w.shape[-1]
    out_dtype = out_dtype or x.dtype
    sub = _sublane_unit(w.dtype)
    tm = _pick_tile(M, tm_target, sub)
    tn = _pick_tile(N, tn_target, 128)
    tk = _pick_tile(K, tk_target, 128)
    vmem = _vmem_limit(
        [((tm, tk), x.dtype), ((tk, tn), w.dtype), ((1, tn), b.dtype),
         ((tm, tn), out_dtype)],
        scratch_bytes=tm * tn * 4)
    kern = functools.partial(_linear_kernel, mxu_dtype=w.dtype)
    return pl.pallas_call(
        kern,
        out_shape=jax.ShapeDtypeStruct((M, N), out_dtype),
        grid=(M // tm, N // tn, K // tk),
        in_specs=[
            pl.BlockSpec((tm, tk), lambda i, j, k: (i, k)),
            pl.BlockSpec((tk, tn), lambda i, j, k: (k, j)),
            pl.BlockSpec((1, tn), lambda i, j, k: (0, j)),
        ],
        out_specs=pl.BlockSpec((tm, tn), lambda i, j, k: (i, j)),
        scratch_shapes=[pltpu.VMEM((tm, tn), jnp.float32)],
        compiler_params=pltpu.CompilerParams(
            dimension_semantics=("parallel", "parallel", "arbitrary"),
            vmem_limit_bytes=vmem,
        ),
    )(x, w, b)


# ----------------------------------------------------------------------------
# Parameters
# ----------------------------------------------------------------------------
def init_multi_head_params(key, d_model):
    """Natural (nn.Linear-like) parameters, (in, out) layout, fp32."""
    bound = 1.0 / math.sqrt(d_model)
    ks = jax.random.split(key, 8)

    def u(k, shape):
        return jax.random.uniform(k, shape, jnp.float32, -bound, bound)

    return {
        "w_q": u(ks[0], (d_model, d_model)), "b_q": u(ks[1], (d_model,)),
        "w_k": u(ks[2], (d_model, d_model)), "b_k": u(ks[3], (d_model,)),
        "w_v": u(ks[4], (d_model, d_model)), "b_v": u(ks[5], (d_model,)),
        "w_o": u(ks[6], (d_model, d_model)), "b_o": u(ks[7], (d_model,)),
    }


def prepare_kernel_params(params, n_head, use_bf16=True):
    """One-time prep: per-head weight panels (H, D, d_k), 1/sqrt(d_k) folded
    into the Q projection, MXU operands optionally cast to bf16."""
    D = params["w_q"].shape[0]
    d_k = D // n_head
    scale = 1.0 / math.sqrt(d_k)
    mxu_dtype = jnp.bfloat16 if use_bf16 else jnp.float32

    def split_w(w):   # (D, D) -> (H, D, d_k)
        return jnp.transpose(w.reshape(D, n_head, d_k), (1, 0, 2)).astype(mxu_dtype)

    def split_b(b):   # (D,) -> (H, 1, d_k) fp32
        return b.reshape(n_head, 1, d_k).astype(jnp.float32)

    return {
        "w_q": split_w(params["w_q"] * scale), "b_q": split_b(params["b_q"] * scale),
        "w_k": split_w(params["w_k"]), "b_k": split_b(params["b_k"]),
        "w_v": split_w(params["w_v"]), "b_v": split_b(params["b_v"]),
        "w_o": params["w_o"].astype(mxu_dtype),
        "b_o": params["b_o"].reshape(1, D).astype(jnp.float32),
    }


# ----------------------------------------------------------------------------
# Forward pass
# ----------------------------------------------------------------------------
def multi_head_forward(kparams, Q, K, V, n_head, mask=None):
    # mask mirrors the reference: its masked_fill result is discarded (no-op).
    del mask
    B, S, D = Q.shape

    # Per-head projections straight into head-major (B, H, S, d_k) layout.
    q = pallas_head_projection(Q, kparams["w_q"], kparams["b_q"])
    k = pallas_head_projection(K, kparams["w_k"], kparams["b_k"])
    v = pallas_head_projection(V, kparams["w_v"], kparams["b_v"])

    # Flash-style attention, tiled over (batch, head, q-block, kv-block).
    attn = pallas_flash_attention(q, k, v)                 # (B, H, S, d_k)

    # Reference's concate(): the (B, H, S, d_k) buffer viewed as (B, S, D).
    # Head-major output makes this a free reshape (no transpose/HBM copy).
    concat = attn.reshape(B * S, D)

    # Output projection (fp32 result).
    out = pallas_linear(concat, kparams["w_o"], kparams["b_o"],
                        out_dtype=jnp.float32)
    return out.reshape(B, S, D)


# ----------------------------------------------------------------------------
# Pure-JAX reference (mirrors the PyTorch module's semantics, fp32)
# ----------------------------------------------------------------------------
def reference_forward(params, Q, K, V, n_head):
    B, S, D = Q.shape
    d_k = D // n_head
    q = Q @ params["w_q"] + params["b_q"]
    k = K @ params["w_k"] + params["b_k"]
    v = V @ params["w_v"] + params["b_v"]

    def splits(x):
        return jnp.transpose(x.reshape(B, S, n_head, d_k), (0, 2, 1, 3))

    qh, kh, vh = splits(q), splits(k), splits(v)
    s = jnp.einsum("bhqd,bhkd->bhqk", qh, kh) / math.sqrt(d_k)
    p = jax.nn.softmax(s, axis=-1)
    attn = jnp.einsum("bhqk,bhkd->bhqd", p, vh)            # (B, H, S, d_k)
    concat = attn.reshape(B, S, D)                         # reference's buggy concat
    return concat @ params["w_o"] + params["b_o"]


# ----------------------------------------------------------------------------
if __name__ == "__main__":
    d_model, n_head = 32, 4
    batch, seq = 2, 8

    key = jax.random.PRNGKey(0)
    kp, kq, kk_, kv_ = jax.random.split(key, 4)
    params = init_multi_head_params(kp, d_model)

    Q = jax.random.normal(kq, (batch, seq, d_model), jnp.float32)
    K = jax.random.normal(kk_, (batch, seq, d_model), jnp.float32)
    V = jax.random.normal(kv_, (batch, seq, d_model), jnp.float32)

    ref = reference_forward(params, Q, K, V, n_head)
    fwd = jax.jit(multi_head_forward, static_argnames=("n_head",))

    # fp32 path: tight agreement with the reference.
    kp32 = prepare_kernel_params(params, n_head, use_bf16=False)
    out32 = jax.block_until_ready(fwd(kp32, Q, K, V, n_head=n_head))
    assert out32.shape == (batch, seq, d_model)
    assert jnp.allclose(out32, ref, rtol=2e-3, atol=2e-3), "fp32 path mismatch"

    # bf16 MXU-operand path (fp32 accumulation / softmax): sanity check only,
    # tolerance covers bf16 quantization of operands and intermediates.
    kpbf = prepare_kernel_params(params, n_head, use_bf16=True)
    outbf = jax.block_until_ready(fwd(kpbf, Q, K, V, n_head=n_head))
    assert outbf.shape == (batch, seq, d_model)
    assert jnp.allclose(outbf, ref, rtol=5e-2, atol=5e-2), "bf16 path mismatch"

    print("KERNEL_OK")
</pallas_src>

<mosaic_0001>
module attributes {stable_mosaic.version = 11 : i64} {
  func.func @_head_proj_kernel(%arg0: i32, %arg1: i32, %arg2: i32, %arg3: i32, %arg4: memref<1x8x32xf32, #tpu.memory_space<vmem>>, %arg5: memref<1x32x8xf32, #tpu.memory_space<vmem>>, %arg6: memref<1x1x8xf32, #tpu.memory_space<vmem>>, %arg7: memref<1x1x8x8xf32, #tpu.memory_space<vmem>>, %arg8: memref<8x8xf32, #tpu.memory_space<vmem>>) attributes {dimension_semantics = [#tpu.dimension_semantics<parallel>, #tpu.dimension_semantics<parallel>, #tpu.dimension_semantics<parallel>, #tpu.dimension_semantics<arbitrary>], iteration_bounds = array<i64: 2, 4, 1, 1>, scalar_prefetch = 0 : i64, scratch_operands = 1 : i64, tpu.core_type = #tpu.core_type<tc>, window_params = [{transform_indices = @transform_0, window_bounds = array<i64: 1, 8, 32>}, {transform_indices = @transform_1, window_bounds = array<i64: 1, 32, 8>}, {transform_indices = @transform_2, window_bounds = array<i64: 1, 1, 8>}, {transform_indices = @transform_3, window_bounds = array<i64: 1, 1, 8, 8>}]} {
    %c0_i32 = arith.constant 0 : i32
    %0 = arith.cmpi eq, %arg3, %c0_i32 : i32
    %1 = arith.extui %0 : i1 to i32
    %c0_i32_0 = arith.constant 0 : i32
    %2 = arith.cmpi ne, %1, %c0_i32_0 : i32
    scf.if %2 {
      %cst_12 = arith.constant 0.000000e+00 : f32
      %14 = vector.broadcast %cst_12 : f32 to vector<8x8xf32>
      %c0_13 = arith.constant 0 : index
      %c0_14 = arith.constant 0 : index
      %15 = vector.load %arg8[%c0_13, %c0_14] : memref<8x8xf32, #tpu.memory_space<vmem>>, vector<8x8xf32>
      tpu.vector_store %arg8[%c0_13, %c0_14], %14 {strides = array<i32>} : memref<8x8xf32, #tpu.memory_space<vmem>>, vector<8x8xf32>,
    } else {
    }
    %c0 = arith.constant 0 : index
    %c0_1 = arith.constant 0 : index
    %3 = vector.load %arg8[%c0, %c0_1] : memref<8x8xf32, #tpu.memory_space<vmem>>, vector<8x8xf32>
    %c0_2 = arith.constant 0 : index
    %c0_3 = arith.constant 0 : index
    %c0_4 = arith.constant 0 : index
    %4 = vector.load %arg4[%c0_2, %c0_3, %c0_4] : memref<1x8x32xf32, #tpu.memory_space<vmem>>, vector<1x8x32xf32>
    %5 = vector.shape_cast %4 : vector<1x8x32xf32> to vector<8x32xf32>
    %c0_5 = arith.constant 0 : index
    %c0_6 = arith.constant 0 : index
    %c0_7 = arith.constant 0 : index
    %6 = vector.load %arg5[%c0_5, %c0_6, %c0_7] : memref<1x32x8xf32, #tpu.memory_space<vmem>>, vector<1x32x8xf32>
    %7 = vector.shape_cast %6 : vector<1x32x8xf32> to vector<32x8xf32>
    %cst = arith.constant dense<0.000000e+00> : vector<8x8xf32>
    %8 = tpu.matmul %5, %7, %cst {dimension_numbers = #tpu.dot_dimension_numbers<[1], [0], [0], [1], [0, 0, 1, 1], [], []>} : vector<8x32xf32>, vector<32x8xf32>, vector<8x8xf32> -> vector<8x8xf32>
    %9 = arith.addf %3, %8 : vector<8x8xf32>
    %c0_8 = arith.constant 0 : index
    %c0_9 = arith.constant 0 : index
    %10 = vector.load %arg8[%c0_8, %c0_9] : memref<8x8xf32, #tpu.memory_space<vmem>>, vector<8x8xf32>
    tpu.vector_store %arg8[%c0_8, %c0_9], %9 {strides = array<i32>} : memref<8x8xf32, #tpu.memory_space<vmem>>, vector<8x8xf32>,
    %c0_i32_10 = arith.constant 0 : i32
    %11 = arith.cmpi eq, %arg3, %c0_i32_10 : i32
    %12 = arith.extui %11 : i1 to i32
    %c0_i32_11 = arith.constant 0 : i32
    %13 = arith.cmpi ne, %12, %c0_i32_11 : i32
    scf.if %13 {
      %c0_12 = arith.constant 0 : index
      %c0_13 = arith.constant 0 : index
      %14 = vector.load %arg8[%c0_12, %c0_13] : memref<8x8xf32, #tpu.memory_space<vmem>>, vector<8x8xf32>
      %c0_14 = arith.constant 0 : index
      %c0_15 = arith.constant 0 : index
      %c0_16 = arith.constant 0 : index
      %15 = vector.load %arg6[%c0_14, %c0_15, %c0_16] : memref<1x1x8xf32, #tpu.memory_space<vmem>>, vector<1x1x8xf32>
      %16 = vector.shape_cast %15 : vector<1x1x8xf32> to vector<1x8xf32>
      %17 = vector.broadcast %16 : vector<1x8xf32> to vector<8x8xf32>
      %18 = arith.addf %14, %17 : vector<8x8xf32>
      %c0_17 = arith.constant 0 : index
      %c0_18 = arith.constant 0 : index
      %c0_19 = arith.constant 0 : index
      %c0_20 = arith.constant 0 : index
      %19 = vector.load %arg7[%c0_17, %c0_18, %c0_19, %c0_20] : memref<1x1x8x8xf32, #tpu.memory_space<vmem>>, vector<1x1x8x8xf32>
      %20 = vector.shape_cast %19 : vector<1x1x8x8xf32> to vector<8x8xf32>
      %21 = vector.shape_cast %18 : vector<8x8xf32> to vector<1x1x8x8xf32>
      tpu.vector_store %arg7[%c0_17, %c0_18, %c0_19, %c0_20], %21 {strides = array<i32>} : memref<1x1x8x8xf32, #tpu.memory_space<vmem>>, vector<1x1x8x8xf32>,
    } else {
    }
    return
  }
  func.func @transform_0(%arg0: i32, %arg1: i32, %arg2: i32, %arg3: i32) -> (i32, i32, i32) {
    %c0_i32 = arith.constant 0 : i32
    return %arg0, %arg2, %arg3 : i32, i32, i32
  }
  func.func @transform_1(%arg0: i32, %arg1: i32, %arg2: i32, %arg3: i32) -> (i32, i32, i32) {
    %c0_i32 = arith.constant 0 : i32
    %c0_i32_0 = arith.constant 0 : i32
    return %arg1, %arg3, %c0_i32 : i32, i32, i32
  }
  func.func @transform_2(%arg0: i32, %arg1: i32, %arg2: i32, %arg3: i32) -> (i32, i32, i32) {
    %c0_i32 = arith.constant 0 : i32
    %c0_i32_0 = arith.constant 0 : i32
    %c0_i32_1 = arith.constant 0 : i32
    return %arg1, %c0_i32, %c0_i32_0 : i32, i32, i32
  }
  func.func @transform_3(%arg0: i32, %arg1: i32, %arg2: i32, %arg3: i32) -> (i32, i32, i32, i32) {
    %c0_i32 = arith.constant 0 : i32
    %c0_i32_0 = arith.constant 0 : i32
    return %arg0, %arg1, %arg2, %c0_i32 : i32, i32, i32, i32
  }
}

module attributes {stable_mosaic.version = 11 : i64} {
  func.func @_flash_attn_kernel(%arg0: i32, %arg1: i32, %arg2: i32, %arg3: i32, %arg4: memref<1x1x8x8xf32, #tpu.memory_space<vmem>>, %arg5: memref<1x1x8x8xf32, #tpu.memory_space<vmem>>, %arg6: memref<1x1x8x8xf32, #tpu.memory_space<vmem>>, %arg7: memref<1x1x8x8xf32, #tpu.memory_space<vmem>>, %arg8: memref<8x1xf32, #tpu.memory_space<vmem>>, %arg9: memref<8x1xf32, #tpu.memory_space<vmem>>, %arg10: memref<8x8xf32, #tpu.memory_space<vmem>>) attributes {dimension_semantics = [#tpu.dimension_semantics<parallel>, #tpu.dimension_semantics<parallel>, #tpu.dimension_semantics<parallel>, #tpu.dimension_semantics<arbitrary>], iteration_bounds = array<i64: 2, 4, 1, 1>, scalar_prefetch = 0 : i64, scratch_operands = 3 : i64, tpu.core_type = #tpu.core_type<tc>, window_params = [{transform_indices = @transform_0, window_bounds = array<i64: 1, 1, 8, 8>}, {transform_indices = @transform_1, window_bounds = array<i64: 1, 1, 8, 8>}, {transform_indices = @transform_2, window_bounds = array<i64: 1, 1, 8, 8>}, {transform_indices = @transform_3, window_bounds = array<i64: 1, 1, 8, 8>}]} {
    %c0_i32 = arith.constant 0 : i32
    %0 = arith.cmpi eq, %arg3, %c0_i32 : i32
    %1 = arith.extui %0 : i1 to i32
    %c0_i32_0 = arith.constant 0 : i32
    %2 = arith.cmpi ne, %1, %c0_i32_0 : i32
    scf.if %2 {
      %cst_29 = arith.constant 0xFF800000 : f32
      %35 = vector.broadcast %cst_29 : f32 to vector<8x1xf32>
      %c0_30 = arith.constant 0 : index
      %c0_31 = arith.constant 0 : index
      %36 = vector.load %arg8[%c0_30, %c0_31] : memref<8x1xf32, #tpu.memory_space<vmem>>, vector<8x1xf32>
      tpu.vector_store %arg8[%c0_30, %c0_31], %35 {strides = array<i32>} : memref<8x1xf32, #tpu.memory_space<vmem>>, vector<8x1xf32>,
      %cst_32 = arith.constant 0.000000e+00 : f32
      %37 = vector.broadcast %cst_32 : f32 to vector<8x1xf32>
      %c0_33 = arith.constant 0 : index
      %c0_34 = arith.constant 0 : index
      %38 = vector.load %arg9[%c0_33, %c0_34] : memref<8x1xf32, #tpu.memory_space<vmem>>, vector<8x1xf32>
      tpu.vector_store %arg9[%c0_33, %c0_34], %37 {strides = array<i32>} : memref<8x1xf32, #tpu.memory_space<vmem>>, vector<8x1xf32>,
      %cst_35 = arith.constant 0.000000e+00 : f32
      %39 = vector.broadcast %cst_35 : f32 to vector<8x8xf32>
      %c0_36 = arith.constant 0 : index
      %c0_37 = arith.constant 0 : index
      %40 = vector.load %arg10[%c0_36, %c0_37] : memref<8x8xf32, #tpu.memory_space<vmem>>, vector<8x8xf32>
      tpu.vector_store %arg10[%c0_36, %c0_37], %39 {strides = array<i32>} : memref<8x8xf32, #tpu.memory_space<vmem>>, vector<8x8xf32>,
    } else {
    }
    %c0 = arith.constant 0 : index
    %c0_1 = arith.constant 0 : index
    %c0_2 = arith.constant 0 : index
    %c0_3 = arith.constant 0 : index
    %3 = vector.load %arg4[%c0, %c0_1, %c0_2, %c0_3] : memref<1x1x8x8xf32, #tpu.memory_space<vmem>>, vector<1x1x8x8xf32>
    %4 = vector.shape_cast %3 : vector<1x1x8x8xf32> to vector<8x8xf32>
    %c0_4 = arith.constant 0 : index
    %c0_5 = arith.constant 0 : index
    %c0_6 = arith.constant 0 : index
    %c0_7 = arith.constant 0 : index
    %5 = vector.load %arg5[%c0_4, %c0_5, %c0_6, %c0_7] : memref<1x1x8x8xf32, #tpu.memory_space<vmem>>, vector<1x1x8x8xf32>
    %6 = vector.shape_cast %5 : vector<1x1x8x8xf32> to vector<8x8xf32>
    %c0_8 = arith.constant 0 : index
    %c0_9 = arith.constant 0 : index
    %c0_10 = arith.constant 0 : index
    %c0_11 = arith.constant 0 : index
    %7 = vector.load %arg6[%c0_8, %c0_9, %c0_10, %c0_11] : memref<1x1x8x8xf32, #tpu.memory_space<vmem>>, vector<1x1x8x8xf32>
    %8 = vector.shape_cast %7 : vector<1x1x8x8xf32> to vector<8x8xf32>
    %cst = arith.constant dense<0.000000e+00> : vector<8x8xf32>
    %9 = tpu.matmul %4, %6, %cst {dimension_numbers = #tpu.dot_dimension_numbers<[1], [1], [0], [0], [0, 0, 1, 0], [], []>} : vector<8x8xf32>, vector<8x8xf32>, vector<8x8xf32> -> vector<8x8xf32>
    %c0_12 = arith.constant 0 : index
    %c0_13 = arith.constant 0 : index
    %10 = vector.load %arg8[%c0_12, %c0_13] : memref<8x1xf32, #tpu.memory_space<vmem>>, vector<8x1xf32>
    %cst_14 = arith.constant dense<0xFF800000> : vector<8xf32>
    %11 = vector.multi_reduction <maximumf>, %9, %cst_14 [1] : vector<8x8xf32> to vector<8xf32>
    %12 = vector.shape_cast %11 : vector<8xf32> to vector<8x1xf32>
    %13 = arith.maximumf %10, %12 : vector<8x1xf32>
    %14 = arith.subf %10, %13 : vector<8x1xf32>
    %15 = math.exp %14 : vector<8x1xf32>
    %16 = vector.broadcast %13 : vector<8x1xf32> to vector<8x8xf32>
    %17 = arith.subf %9, %16 : vector<8x8xf32>
    %18 = math.exp %17 : vector<8x8xf32>
    %c0_15 = arith.constant 0 : index
    %c0_16 = arith.constant 0 : index
    %19 = vector.load %arg9[%c0_15, %c0_16] : memref<8x1xf32, #tpu.memory_space<vmem>>, vector<8x1xf32>
    %20 = arith.mulf %15, %19 : vector<8x1xf32>
    %cst_17 = arith.constant dense<0.000000e+00> : vector<8xf32>
    %21 = vector.multi_reduction <add>, %18, %cst_17 [1] : vector<8x8xf32> to vector<8xf32>
    %22 = vector.shape_cast %21 : vector<8xf32> to vector<8x1xf32>
    %23 = arith.addf %20, %22 : vector<8x1xf32>
    %c0_18 = arith.constant 0 : index
    %c0_19 = arith.constant 0 : index
    %24 = vector.load %arg9[%c0_18, %c0_19] : memref<8x1xf32, #tpu.memory_space<vmem>>, vector<8x1xf32>
    tpu.vector_store %arg9[%c0_18, %c0_19], %23 {strides = array<i32>} : memref<8x1xf32, #tpu.memory_space<vmem>>, vector<8x1xf32>,
    %c0_20 = arith.constant 0 : index
    %c0_21 = arith.constant 0 : index
    %25 = vector.load %arg10[%c0_20, %c0_21] : memref<8x8xf32, #tpu.memory_space<vmem>>, vector<8x8xf32>
    %26 = vector.broadcast %15 : vector<8x1xf32> to vector<8x8xf32>
    %27 = arith.mulf %26, %25 : vector<8x8xf32>
    %cst_22 = arith.constant dense<0.000000e+00> : vector<8x8xf32>
    %28 = tpu.matmul %18, %8, %cst_22 {dimension_numbers = #tpu.dot_dimension_numbers<[1], [0], [0], [1], [0, 0, 1, 1], [], []>} : vector<8x8xf32>, vector<8x8xf32>, vector<8x8xf32> -> vector<8x8xf32>
    %29 = arith.addf %27, %28 : vector<8x8xf32>
    %c0_23 = arith.constant 0 : index
    %c0_24 = arith.constant 0 : index
    %30 = vector.load %arg10[%c0_23, %c0_24] : memref<8x8xf32, #tpu.memory_space<vmem>>, vector<8x8xf32>
    tpu.vector_store %arg10[%c0_23, %c0_24], %29 {strides = array<i32>} : memref<8x8xf32, #tpu.memory_space<vmem>>, vector<8x8xf32>,
    %c0_25 = arith.constant 0 : index
    %c0_26 = arith.constant 0 : index
    %31 = vector.load %arg8[%c0_25, %c0_26] : memref<8x1xf32, #tpu.memory_space<vmem>>, vector<8x1xf32>
    tpu.vector_store %arg8[%c0_25, %c0_26], %13 {strides = array<i32>} : memref<8x1xf32, #tpu.memory_space<vmem>>, vector<8x1xf32>,
    %c0_i32_27 = arith.constant 0 : i32
    %32 = arith.cmpi eq, %arg3, %c0_i32_27 : i32
    %33 = arith.extui %32 : i1 to i32
    %c0_i32_28 = arith.constant 0 : i32
    %34 = arith.cmpi ne, %33, %c0_i32_28 : i32
    scf.if %34 {
      %c0_29 = arith.constant 0 : index
      %c0_30 = arith.constant 0 : index
      %35 = vector.load %arg9[%c0_29, %c0_30] : memref<8x1xf32, #tpu.memory_space<vmem>>, vector<8x1xf32>
      %cst_31 = arith.constant 1.000000e+00 : f32
      %36 = vector.broadcast %cst_31 : f32 to vector<8x1xf32>
      %37 = arith.divf %36, %35 : vector<8x1xf32>
      %c0_32 = arith.constant 0 : index
      %c0_33 = arith.constant 0 : index
      %38 = vector.load %arg10[%c0_32, %c0_33] : memref<8x8xf32, #tpu.memory_space<vmem>>, vector<8x8xf32>
      %39 = vector.broadcast %37 : vector<8x1xf32> to vector<8x8xf32>
      %40 = arith.mulf %38, %39 : vector<8x8xf32>
      %c0_34 = arith.constant 0 : index
      %c0_35 = arith.constant 0 : index
      %c0_36 = arith.constant 0 : index
      %c0_37 = arith.constant 0 : index
      %41 = vector.load %arg7[%c0_34, %c0_35, %c0_36, %c0_37] : memref<1x1x8x8xf32, #tpu.memory_space<vmem>>, vector<1x1x8x8xf32>
      %42 = vector.shape_cast %41 : vector<1x1x8x8xf32> to vector<8x8xf32>
      %43 = vector.shape_cast %40 : vector<8x8xf32> to vector<1x1x8x8xf32>
      tpu.vector_store %arg7[%c0_34, %c0_35, %c0_36, %c0_37], %43 {strides = array<i32>} : memref<1x1x8x8xf32, #tpu.memory_space<vmem>>, vector<1x1x8x8xf32>,
    } else {
    }
    return
  }
  func.func @transform_0(%arg0: i32, %arg1: i32, %arg2: i32, %arg3: i32) -> (i32, i32, i32, i32) {
    %c0_i32 = arith.constant 0 : i32
    %c0_i32_0 = arith.constant 0 : i32
    return %arg0, %arg1, %arg2, %c0_i32 : i32, i32, i32, i32
  }
  func.func @transform_1(%arg0: i32, %arg1: i32, %arg2: i32, %arg3: i32) -> (i32, i32, i32, i32) {
    %c0_i32 = arith.constant 0 : i32
    %c0_i32_0 = arith.constant 0 : i32
    return %arg0, %arg1, %arg3, %c0_i32 : i32, i32, i32, i32
  }
  func.func @transform_2(%arg0: i32, %arg1: i32, %arg2: i32, %arg3: i32) -> (i32, i32, i32, i32) {
    %c0_i32 = arith.constant 0 : i32
    %c0_i32_0 = arith.constant 0 : i32
    return %arg0, %arg1, %arg3, %c0_i32 : i32, i32, i32, i32
  }
  func.func @transform_3(%arg0: i32, %arg1: i32, %arg2: i32, %arg3: i32) -> (i32, i32, i32, i32) {
    %c0_i32 = arith.constant 0 : i32
    %c0_i32_0 = arith.constant 0 : i32
    return %arg0, %arg1, %arg2, %c0_i32 : i32, i32, i32, i32
  }
}

module attributes {stable_mosaic.version = 11 : i64} {
  func.func @_linear_kernel(%arg0: i32, %arg1: i32, %arg2: i32, %arg3: memref<16x32xf32, #tpu.memory_space<vmem>>, %arg4: memref<32x32xf32, #tpu.memory_space<vmem>>, %arg5: memref<1x32xf32, #tpu.memory_space<vmem>>, %arg6: memref<16x32xf32, #tpu.memory_space<vmem>>, %arg7: memref<16x32xf32, #tpu.memory_space<vmem>>) attributes {dimension_semantics = [#tpu.dimension_semantics<parallel>, #tpu.dimension_semantics<parallel>, #tpu.dimension_semantics<arbitrary>], iteration_bounds = array<i64: 1, 1, 1>, scalar_prefetch = 0 : i64, scratch_operands = 1 : i64, tpu.core_type = #tpu.core_type<tc>, window_params = [{transform_indices = @transform_0, window_bounds = array<i64: 16, 32>}, {transform_indices = @transform_1, window_bounds = array<i64: 32, 32>}, {transform_indices = @transform_2, window_bounds = array<i64: 1, 32>}, {transform_indices = @transform_3, window_bounds = array<i64: 16, 32>}]} {
    %c0_i32 = arith.constant 0 : i32
    %0 = arith.cmpi eq, %arg2, %c0_i32 : i32
    %1 = arith.extui %0 : i1 to i32
    %c0_i32_0 = arith.constant 0 : i32
    %2 = arith.cmpi ne, %1, %c0_i32_0 : i32
    scf.if %2 {
      %cst_10 = arith.constant 0.000000e+00 : f32
      %12 = vector.broadcast %cst_10 : f32 to vector<16x32xf32>
      %c0_11 = arith.constant 0 : index
      %c0_12 = arith.constant 0 : index
      %13 = vector.load %arg7[%c0_11, %c0_12] : memref<16x32xf32, #tpu.memory_space<vmem>>, vector<16x32xf32>
      tpu.vector_store %arg7[%c0_11, %c0_12], %12 {strides = array<i32>} : memref<16x32xf32, #tpu.memory_space<vmem>>, vector<16x32xf32>,
    } else {
    }
    %c0 = arith.constant 0 : index
    %c0_1 = arith.constant 0 : index
    %3 = vector.load %arg7[%c0, %c0_1] : memref<16x32xf32, #tpu.memory_space<vmem>>, vector<16x32xf32>
    %c0_2 = arith.constant 0 : index
    %c0_3 = arith.constant 0 : index
    %4 = vector.load %arg3[%c0_2, %c0_3] : memref<16x32xf32, #tpu.memory_space<vmem>>, vector<16x32xf32>
    %c0_4 = arith.constant 0 : index
    %c0_5 = arith.constant 0 : index
    %5 = vector.load %arg4[%c0_4, %c0_5] : memref<32x32xf32, #tpu.memory_space<vmem>>, vector<32x32xf32>
    %cst = arith.constant dense<0.000000e+00> : vector<16x32xf32>
    %6 = tpu.matmul %4, %5, %cst {dimension_numbers = #tpu.dot_dimension_numbers<[1], [0], [0], [1], [0, 0, 1, 1], [], []>} : vector<16x32xf32>, vector<32x32xf32>, vector<16x32xf32> -> vector<16x32xf32>
    %7 = arith.addf %3, %6 : vector<16x32xf32>
    %c0_6 = arith.constant 0 : index
    %c0_7 = arith.constant 0 : index
    %8 = vector.load %arg7[%c0_6, %c0_7] : memref<16x32xf32, #tpu.memory_space<vmem>>, vector<16x32xf32>
    tpu.vector_store %arg7[%c0_6, %c0_7], %7 {strides = array<i32>} : memref<16x32xf32, #tpu.memory_space<vmem>>, vector<16x32xf32>,
    %c0_i32_8 = arith.constant 0 : i32
    %9 = arith.cmpi eq, %arg2, %c0_i32_8 : i32
    %10 = arith.extui %9 : i1 to i32
    %c0_i32_9 = arith.constant 0 : i32
    %11 = arith.cmpi ne, %10, %c0_i32_9 : i32
    scf.if %11 {
      %c0_10 = arith.constant 0 : index
      %c0_11 = arith.constant 0 : index
      %12 = vector.load %arg7[%c0_10, %c0_11] : memref<16x32xf32, #tpu.memory_space<vmem>>, vector<16x32xf32>
      %c0_12 = arith.constant 0 : index
      %c0_13 = arith.constant 0 : index
      %13 = vector.load %arg5[%c0_12, %c0_13] : memref<1x32xf32, #tpu.memory_space<vmem>>, vector<1x32xf32>
      %14 = vector.broadcast %13 : vector<1x32xf32> to vector<16x32xf32>
      %15 = arith.addf %12, %14 : vector<16x32xf32>
      %c0_14 = arith.constant 0 : index
      %c0_15 = arith.constant 0 : index
      %16 = vector.load %arg6[%c0_14, %c0_15] : memref<16x32xf32, #tpu.memory_space<vmem>>, vector<16x32xf32>
      tpu.vector_store %arg6[%c0_14, %c0_15], %15 {strides = array<i32>} : memref<16x32xf32, #tpu.memory_space<vmem>>, vector<16x32xf32>,
    } else {
    }
    return
  }
  func.func @transform_0(%arg0: i32, %arg1: i32, %arg2: i32) -> (i32, i32) {
    %c0_i32 = arith.constant 0 : i32
    return %arg0, %arg2 : i32, i32
  }
  func.func @transform_1(%arg0: i32, %arg1: i32, %arg2: i32) -> (i32, i32) {
    %c0_i32 = arith.constant 0 : i32
    return %arg2, %arg1 : i32, i32
  }
  func.func @transform_2(%arg0: i32, %arg1: i32, %arg2: i32) -> (i32, i32) {
    %c0_i32 = arith.constant 0 : i32
    %c0_i32_0 = arith.constant 0 : i32
    return %c0_i32, %arg1 : i32, i32
  }
  func.func @transform_3(%arg0: i32, %arg1: i32, %arg2: i32) -> (i32, i32) {
    %c0_i32 = arith.constant 0 : i32
    return %arg0, %arg1 : i32, i32
  }
}

</mosaic_0001>

<bundles_post_ra>
// kernel: multi_head_forward.8
= control target key start
LH: loop header
LB: loop body
LE: loop exit
PB: predicated region body
PF: predicated region fallthrough
CT: control target
= control target key end

     0   :  { %s824_s12 = smov 0   ;;  %s826_s13 = smov 0   ;;  %s899_s0 = inlined_call_operand.vmem [shape: f32[2,4,8,8], index: 0, kind: input, shape index: {}]   ;;  %s900_s1 = inlined_call_operand.vmem [shape: f32[2,4,8,8], index: 1, kind: input, shape index: {}]   ;;  %s901_s2 = inlined_call_operand.vmem [shape: f32[2,4,8,8], index: 2, kind: input, shape index: {}]   ;;  %s902_s3 = inlined_call_operand.vmem [shape: f32[2,4,8,8], index: 3, kind: output, shape index: {}]  }
   0x1   :  { %s828_s14 = smov 0   ;;  %s830_s15 = smov 0  }
   0x2   :  { %s832_s16 = smov 0  }
   0x3 LB: > { %s35_s17 = sadd.s32 1, %s790_s14  ;;  %s39_s18 = sadd.s32 1, %s794_s15  ;;  %s798_s16 = sphi %s832_s16, %s13_s16   ;;  %s794_s15 = sphi %s830_s15, %s906_s15   ;;  %s790_s14 = sphi %s828_s14, %s905_s14   ;;  %s786_s13 = sphi %s826_s13, %s904_s13   ;;  %s782_s12 = sphi %s824_s12, %s903_s12  }
   0x4   : > { %p37_p0 = scmp.ge.s32.totalorder %s35_s17, 4  ;;  %p680_p1 = scmp.ge.s32.totalorder %s798_s16, 1 }
   0x5   : > { %p217_p2 = scmp.lt.s32.totalorder %s798_s16, 9 }
   0x6   : > { %s908_s17 = smov (%p37_p0, %s35_s17), 0  ;;  %s910_s18 = smov (!%p37_p0, %s39_s18), %s794_s15 }
   0x7   : > { %p218_p3 = pnand %p680_p1, %p217_p2  ;;  %p41_p4 = scmp.ge.s32.totalorder %s910_s18, 2 }
   0x8   : > { %p275_p5 = scmp.lt.s32.totalorder (!%p218_p3), %s786_s13, 1  ;;  %p277_p6 = scmp.lt.s32.totalorder (!%p218_p3), %s782_s12, 3  ;;  %vm326_vm0 = vcmask (!%p218_p3), 64512   ;;  %v800_v0 = vmov (!%p218_p3), 0.0   ;;  %vm801_vm1 = vmmov (!%p218_p3), 0   ;;  %vm323_vm2 = vcmask (!%p218_p3), 7168  }
   0x9   : > { %s912_s18 = smov (%p41_p4, %s910_s18), 0  ;;  %221 = sbr.rel (%p218_p3) target bundleno = 820 (0x334), region = 32 }
   0xa   : > { %698 = vmatprep.subr.mxu0 (!%p218_p3), %v800_v0  ;;  %327 = vst.msk [vmem:[#allocation4] sm:$0xff] (!%p218_p3), %vm326_vm0, %v800_v0  ;;  %700 = vmatprep.mubr.msk.f32.mxu0 (!%p218_p3), %vm801_vm1, %v800_v0  ;;  %v802_v3 = vmov (!%p218_p3), -inf   ;;  %v803_v7 = vmov (!%p218_p3), 0  }
   0xb   : > { %703 = vmatprep.subr.mxu1 (!%p218_p3), %v800_v0  ;;  %705 = vmatprep.mubr.msk.f32.mxu1 (!%p218_p3), %vm801_vm1, %v800_v0  ;;  %324 = vst.msk [vmem:[#allocation2] sm:$0xff] (!%p218_p3), %vm323_vm2, %v802_v3  ;;  %325 = vst.msk [vmem:[#allocation3] sm:$0xff] (!%p218_p3), %vm323_vm2, %v800_v0 }
   0xc   : > { %752 = vset.pattern.permute.xlu0 (!%p218_p3), %v803_v7  ;;  %753 = vset.pattern.permute.xlu1 (!%p218_p3), %v803_v7 }
  0x10   : > { %s914_s13 = smov (!%p275_p5, %s786_s13), 1  ;;  %s916_s12 = smov (!%p277_p6, %s782_s12), 3 }
  0x11   : > { %s681_s19 = sshll.u32 %s914_s13, 2  ;;  %v432_v26 = vld [vmem:[#allocation4] sm:$0xff] }
  0x12   : > { %s283_s20 = sadd.s32 %s681_s19, %s916_s12  ;;  %v408_v8 = vld [vmem:[#allocation2] sm:$0xff]  ;;  %v424_v20 = vld [vmem:[#allocation3] sm:$0xff] }
  0x13   : > { %s855_s21 = sshll.u32 %s283_s20, 3 }
  0x14   : > { %s296_s24 = scalar_lea.vmem %s900_s1, %s855_s21  ;;  %s285_s27 = scalar_lea.vmem %s899_s0, %s855_s21 }
  0x15   : > { %v329_v1 = vld [vmem:[%s296_s24] sm:$0xff]  ;;  %s307_s30 = scalar_lea.vmem %s901_s2, %s855_s21  ;;  %s318_s6 = scalar_lea.vmem %s902_s3, %s855_s21 }
  0x16   : > { %699 = vmatpush3.xpose.msk.msra.mxu0 %vm326_vm0, %v329_v1  ;;  %v328_v2 = vld [vmem:[%s285_s27] sm:$0xff] }
  0x17   : > { %v330_v12 = vld [vmem:[%s307_s30] sm:$0xff] }
  0x18   : > { %704 = vmatpush3.msra.mxu1 %v330_v12 }
  0x19   : > { %701 = vmatmul.mubr.msk.f32.vlgmr.msra.gmra.mrb[0].mxu0 %vm326_vm0, %v328_v2 }
  0xec   : > { %v404_v4 = vpop.f32.mrb[0].mxu0 }
  0xed   : > { %v702_v5 = vpop.f32.mrb[1].mxu0  ;;  %v409_v6 = vsel %vm326_vm0, %v404_v4, -inf }
  0xee   : > { %410 = vmax.xlane.f32.xlu0 %v409_v6 }
 0x17b   : > { %v411_v9 = vpop.xlane.xlu0 %410 }
 0x17c   : > { %v412_v10 = vmax.f32 %v408_v8, %v411_v9 }
 0x17e   : > { %v413_v11 = vsub.f32 %v408_v8, %v412_v10  ;;  %514 = vst.msk [vmem:[#allocation2] sm:$0xff] %vm323_vm2, %v412_v10  ;;  %418 = vperm.xlu0 %752, %v412_v10  }
 0x180   : > { %v414_v18 = vmul.f32 1.442695, %v413_v11 }
 0x1fd   : > { %v419_v13 = vpop.permute.xlu0 %418 }
 0x1fe   : > { %v421_v14 = vsub.f32 %v404_v4, %v419_v13 }
 0x200   : > { %v422_v15 = vmul.f32 1.442695, %v421_v14 }
 0x202   : > { %754 = vpow2.f32 %v422_v15 }
 0x203   : > { %756 = vpow2.f32 %v414_v18 }
 0x20c   : > { %v755_v16 = vpop.eup %754 }
 0x20d   : > { %706 = vmatmul.mubr.msk.f32.vlgmr.msra.gmra.mrb[0].mxu1 %vm326_vm0, %v755_v16  ;;  %v426_v17 = vsel %vm326_vm0, %v755_v16, 0.0  ;;  %v757_v19 = vpop.eup %756 }
 0x20e   : > { %427 = vadd.xlane.f32.xlu1 %v426_v17  ;;  %v425_v21 = vmul.f32 %v757_v19, %v424_v20 }
 0x21f   : > { %435 = vperm.xlu1 %753, %v757_v19  }
 0x29b   : > { %v428_v22 = vpop.xlane.xlu1 %427 }
 0x29c   : > { %v429_v23 = vadd.f32 %v428_v22, %v425_v21 }
 0x29e   : > { %431 = vst.msk [vmem:[#allocation3] sm:$0xff] %vm323_vm2, %v429_v23 }
 0x29f   : > { %v436_v27 = vpop.permute.xlu1 %435 }
 0x2a0   : > { %v438_v28 = vmul.f32 %v436_v27, %v432_v26 }
 0x2a5   : > { %v518_v24 = vld [vmem:[#allocation3] sm:$0xff] }
 0x2a6   : > { %758 = vrcp.f32 %v518_v24 }
 0x2b0   : > { %v759_v25 = vpop.eup %758 }
 0x2b1   : > { %524 = vperm.xlu1 %753, %v759_v25  }
 0x2e0   : > { %v508_v29 = vpop.f32.mrb[0].mxu1 }
 0x2e1   : > { %v512_v30 = vadd.f32 %v508_v29, %v438_v28  ;;  %v707_v31 = vpop.f32.mrb[1].mxu1 }
 0x2e3   : > { %513 = vst.msk [vmem:[#allocation4] sm:$0xff] %vm326_vm0, %v512_v30 }
 0x2ea   : > { %v521_v32 = vld [vmem:[#allocation4] sm:$0xff] }
 0x330   : > { %v525_v33 = vpop.permute.xlu1 %524 }
 0x331   : > { %v527_v34 = vmul.f32 %v525_v33, %v521_v32 }
 0x333   : > { %528 = vst.msk [vmem:[%s318_s6] sm:$0xff] %vm326_vm0, %v527_v34 }
 0x334 PF: > { %s13_s16 = sadd.s32 1, %s798_s16   ;;  %s903_s12 = smov %s790_s14 }
 0x335   : > { %p10_p7 = scmp.ge.s32.totalorder %s13_s16, 10   ;;  %s904_s13 = smov %s794_s15 }
 0x336   : > { %s905_s14 = smov %s908_s17  ;;  %s906_s15 = smov %s912_s18 }
 0x337   :  { %12 = sbr.rel (!%p10_p7) target bundleno = 3 (0x3), region = 76 }

// kernel: multi_head_forward.6
= control target key start
LH: loop header
LB: loop body
LE: loop exit
PB: predicated region body
PF: predicated region fallthrough
CT: control target
= control target key end

     0   :  { %s656_s12 = smov 0   ;;  %s658_s13 = smov 0   ;;  %s716_s0 = inlined_call_operand.vmem [shape: f32[2,8,32], index: 0, kind: input, shape index: {}]   ;;  %s717_s1 = inlined_call_operand.vmem [shape: f32[4,32,8], index: 1, kind: input, shape index: {}]   ;;  %s718_s2 = inlined_call_operand.vmem [shape: f32[4,1,8], index: 2, kind: input, shape index: {}]   ;;  %s719_s3 = inlined_call_operand.vmem [shape: f32[2,4,8,8], index: 3, kind: output, shape index: {}]  }
   0x1   :  { %s660_s14 = smov 0   ;;  %s662_s15 = smov 0  }
   0x2   :  { %s664_s16 = smov 0  }
   0x3 LB: > { %s35_s17 = sadd.s32 1, %s623_s14  ;;  %s39_s18 = sadd.s32 1, %s627_s15  ;;  %s631_s16 = sphi %s664_s16, %s13_s16   ;;  %s627_s15 = sphi %s662_s15, %s723_s15   ;;  %s623_s14 = sphi %s660_s14, %s722_s14   ;;  %s619_s13 = sphi %s658_s13, %s721_s13   ;;  %s615_s12 = sphi %s656_s12, %s720_s12  }
   0x4   : > { %p37_p0 = scmp.ge.s32.totalorder %s35_s17, 4  ;;  %p517_p1 = scmp.ge.s32.totalorder %s631_s16, 1 }
   0x5   : > { %p201_p2 = scmp.lt.s32.totalorder %s631_s16, 9 }
   0x6   : > { %s725_s17 = smov (%p37_p0, %s35_s17), 0  ;;  %s727_s18 = smov (!%p37_p0, %s39_s18), %s627_s15 }
   0x7   : > { %p202_p3 = pnand %p517_p1, %p201_p2  ;;  %p41_p4 = scmp.ge.s32.totalorder %s727_s18, 2 }
   0x8   : > { %p259_p5 = scmp.lt.s32.totalorder (!%p202_p3), %s615_s12, 3  ;;  %vm286_vm0 = vcmask (!%p202_p3), 64512   ;;  %p248_p6 = scmp.lt.s32.totalorder (!%p202_p3), %s619_s13, 1  ;;  %v633_v0 = vmov (!%p202_p3), 0.0|0.0   ;;  %v634_v1 = vmov (!%p202_p3), 0.0   ;;  %vm635_vm1 = vmmov (!%p202_p3), 0  }
   0x9   : > { %s729_s18 = smov (%p41_p4, %s727_s18), 0  ;;  %205 = sbr.rel (%p202_p3) target bundleno = 254 (0xfe), region = 32 }
   0xa   : > { %544 = vmatprep.subr.bf16.mxu0 (!%p202_p3), %v633_v0  ;;  %287 = vst.msk [vmem:[#allocation2] sm:$0xff] (!%p202_p3), %vm286_vm0, %v634_v1  ;;  %541 = vmatprep.mubr.msk.f32.mxu0 (!%p202_p3), %vm635_vm1, %v634_v1  ;;  %vm294_vm2 = vcmask (!%p202_p3), 261120  }
  0x10   : > { %s731_s12 = smov (!%p259_p5, %s615_s12), 3  ;;  %s733_s13 = smov (!%p248_p6, %s619_s13), 1 }
  0x11   : > { %s527_s19 = sshll.u32 %s731_s12, 5  ;;  %s521_s23 = sshll.u32 %s733_s13, 2  ;;  %v288_v9 = vld [vmem:[#allocation2] sm:$0xff] }
  0x12   : > { %s266_s22 = scalar_lea.vmem %s717_s1, %s527_s19  ;;  %s518_s24 = sshll.u32 %s733_s13, 3 }
  0x13   : > { %v290_v2 = vld [vmem:[%s266_s22] sm:$0xff]  ;;  %v291_v3 = vld [vmem:[%s266_s22 + $0x8] sm:$0xff]  ;;  %v292_v4 = vld [vmem:[%s266_s22 + $0x10] sm:$0xff]  ;;  %s279_s25 = sadd.s32 %s521_s23, %s731_s12  ;;  %s257_s28 = scalar_lea.vmem %s716_s0, %s518_s24 }
  0x14   : > { %v545_v5 = vpack.c.bf16 %v291_v3, %v290_v2  ;;  %v293_v6 = vld [vmem:[%s266_s22 + $0x18] sm:$0xff]  ;;  %v289_v8 = vld [vmem:[%s257_s28] sm:$0xff]  ;;  %s270_s4 = scalar_lea.vmem %s718_s2, %s731_s12  ;;  %s522_s5 = sshll.u32 %s279_s25, 3 }
  0x15   : > { %v548_v7 = vpack.c.bf16 %v293_v6, %v292_v4  ;;  %v524_v13 = vld [vmem:[%s270_s4] ss:$0 sm:$0xff]  ;;  %s281_s8 = scalar_lea.vmem %s719_s3, %s522_s5 }
  0x16   : > { %546 = vmatpush3.bf16.msra.mxu0 %v545_v5 }
  0x17   : > { %547 = vmatprep.subr.bf16.mxu0 %v633_v0 }
  0x1a   : > { %549 = vmatpush3.bf16.msra.mxu0 %v548_v7 }
  0x1d   : > { %542 = vmatmul.mubr.msk.f32.vlgmr.msra.gmra.mrb[0].mxu0 %vm294_vm2, %v289_v8 }
  0xf0   : > { %v364_v10 = vpop.f32.mrb[0].mxu0 }
  0xf1   : > { %v368_v11 = vadd.f32 %v364_v10, %v288_v9  ;;  %v543_v12 = vpop.f32.mrb[1].mxu0 }
  0xf3   : > { %370 = vst.msk [vmem:[#allocation2] sm:$0xff] %vm286_vm0, %v368_v11 }
  0xfa   : > { %v374_v14 = vld [vmem:[#allocation2] sm:$0xff] }
  0xfb   : > { %v382_v15 = vadd.f32 %v524_v13, %v374_v14 }
  0xfd   : > { %383 = vst.msk [vmem:[%s281_s8] sm:$0xff] %vm286_vm0, %v382_v15 }
  0xfe PF: > { %s13_s16 = sadd.s32 1, %s631_s16   ;;  %s720_s12 = smov %s623_s14 }
  0xff   : > { %p10_p7 = scmp.ge.s32.totalorder %s13_s16, 10   ;;  %s721_s13 = smov %s627_s15 }
 0x100   : > { %s722_s14 = smov %s725_s17  ;;  %s723_s15 = smov %s729_s18 }
 0x101   :  { %12 = sbr.rel (!%p10_p7) target bundleno = 3 (0x3), region = 76 }

// kernel: multi_head_forward.9
= control target key start
LH: loop header
LB: loop body
LE: loop exit
PB: predicated region body
PF: predicated region fallthrough
CT: control target
= control target key end

     0   :  { %vm19_vm0 = vcmask 261120   ;;  %v204_v6 = vmov 0.0   ;;  %s269_s0 = inlined_call_operand.vmem [shape: f32[16,32], index: 0, kind: input, shape index: {}]   ;;  %s270_s1 = inlined_call_operand.vmem [shape: f32[32,32], index: 1, kind: input, shape index: {}]   ;;  %s271_s2 = inlined_call_operand.vmem [shape: f32[1,32], index: 2, kind: input, shape index: {}]   ;;  %s272_s3 = inlined_call_operand.hbm [shape: f32[16,32], index: 3, kind: output, shape index: {}]  }
   0x1   :  { %v26_v0 = vld [vmem:[%s270_s1] sm:$0xff]  ;;  %v27_v1 = vld [vmem:[%s270_s1 + $0x8] sm:$0xff]  ;;  %v28_v2 = vld [vmem:[%s270_s1 + $0x10] sm:$0xff]  ;;  %21 = vst.msk [vmem:[#allocation2 + $0x8] sm:$0xff] %vm19_vm0, %v204_v6 }
   0x2   :  { %v168_v3 = vpack.c.bf16 %v27_v1, %v26_v0  ;;  %v29_v4 = vld [vmem:[%s270_s1 + $0x18] sm:$0xff]  ;;  %v24_v5 = vld [vmem:[%s269_s0] sm:$0xff]  ;;  %20 = vst.msk [vmem:[#allocation2] sm:$0xff] %vm19_vm0, %v204_v6 }
   0x3   :  { %v172_v7 = vpack.c.bf16 %v29_v4, %v28_v2  ;;  %165 = vmatprep.mubr.msk.f32.mxu0 %vm19_vm0, %v24_v5 }
   0x4   :  { %8 = vsyncpa [#allocation4], 0  ;;  %169 = vmatprep.subr.bf16.mxu0 %v168_v3  ;;  %v25_v8 = vld [vmem:[%s269_s0 + $0x8] sm:$0xff]  ;;  %v150_v15 = vld [vmem:[%s271_s2] ss:$0 sm:$0xff]  ;;  %s205_s25 = smov [#allocation3]  }
   0x5   :  { %171 = vmatpush3.bf16.msra.mxu0 %v168_v3  ;;  %s137_s26 = sshll.u32 %s205_s25, 4  ;;  %s138_s26 = int_to_ptr.vmem [resolvable:$true] %s137_s26 }
   0x6   :  { %173 = vmatprep.subr.bf16.mxu0 %v172_v7  ;;  %s180_s0 = scalar_lea.vmem %s138_s26, 256  ;;  %p185_p1 = scmp.lt.s32.totalorder %s138_s26, %s138_s26 }
   0x7   :  { %p181_p0 = scmp.ne.s32.totalorder %s138_s26, %s180_s0  ;;  %p186_p2 = scmp.lt.s32.totalorder %s180_s0, %s180_s0 }
   0x8   :  { %v23_v9 = vld [vmem:[#allocation2 + $0x8] sm:$0xff] }
   0x9   :  { %175 = vmatpush3.bf16.msra.mxu0 %v172_v7  ;;  %v22_v10 = vld [vmem:[#allocation2] sm:$0xff]  ;;  %p187_p3 = por %p186_p2, %p185_p1 }
   0xb   :  { %p188_p4 = pnand %p187_p3, %p181_p0 }
   0xc   :  { %166 = vmatmul.mubr.msk.f32.vlgmr.msra.gmra.mrb[0].mxu0 %vm19_vm0, %v25_v8 }
  0xdf   :  { %v167_v11 = vpop.f32.mrb[0].mxu0 }
  0xe0   :  { %v113_v12 = vadd.f32 %v167_v11, %v23_v9  ;;  %v103_v13 = vpop.f32.mrb[1].mxu0 }
  0xe1   :  { %v112_v14 = vadd.f32 %v103_v13, %v22_v10 }
  0xe2   :  { %115 = vst.msk [vmem:[#allocation2 + $0x8] sm:$0xff] %vm19_vm0, %v113_v12 }
  0xe3   :  { %114 = vst.msk [vmem:[#allocation2] sm:$0xff] %vm19_vm0, %v112_v14 }
  0xe9   :  { %v120_v16 = vld [vmem:[#allocation2 + $0x8] sm:$0xff] }
  0xea   :  { %v119_v17 = vld [vmem:[#allocation2] sm:$0xff]  ;;  %v129_v18 = vadd.f32 %v150_v15, %v120_v16 }
  0xeb   :  { %v128_v19 = vadd.f32 %v150_v15, %v119_v17 }
  0xec   :  { %131 = vst.msk [vmem:[#allocation3 + $0x8] sm:$0xff] %vm19_vm0, %v129_v18 }
  0xed   :  { %130 = vst.msk [vmem:[#allocation3] sm:$0xff] %vm19_vm0, %v128_v19 }
  0xee   :  { %191 = shalt.err (!%p188_p4)
}
  0xef   :  { %s192_s28 = scalar_lea.hbm %s272_s3, 256 }
  0xf0   :  { %p193_p5 = scmp.ne.s32.totalorder %s272_s3, %s192_s28  ;;  %p196_p6 = scmp.lt.u32.totalorder %s192_s28, %s272_s3 }
  0xf2   :  { %p198_p7 = pnand %p196_p6, %p193_p5 }
  0xf4   :  { %201 = shalt.err (!%p198_p7)
}
  0xf5   :  { %s206_s6 = smov 128   ;;  %s207_s7 = smov 8  }
  0xf6   :  { %143 = dma.vmem_to_hbm [thread:$0]  %s138_s26, 256, %s272_s3, [#allocation4], %s206_s6, %s206_s6, %s207_s7  }
  0xf7   :  { %202 = dma.done.wait [#allocation4], 256  }
  0xf8   :  { %203 = vsyncadd [#allocation4], 4294967040 }
  0xf9   :  { %147 = vsyncpa [#allocation4], 1 }

</bundles_post_ra>
